<compile_context>
chip_gen: v7x
topology: tpu7x:2x2x1
jax: 0.10.0
libtpu: 0.0.40
codegen_flags: <defaults>
</compile_context>

<pallas_src>
import math
from functools import partial

import jax
import jax.numpy as jnp
from jax.experimental import pallas as pl
from jax.experimental.pallas import tpu as pltpu

LN_EPS = 1e-12  # BERT default layer_norm_eps


def _pick_tile(dim, candidates):
    """Largest candidate tile that evenly divides dim; else full dim."""
    for c in candidates:
        if dim >= c and dim % c == 0:
            return c
    return dim


# ----------------------- dense (bias [+ GELU]) kernel -----------------------

def _dense_kernel(x_ref, w_ref, b_ref, o_ref, acc_ref, *, activation):
    @pl.when(pl.program_id(2) == 0)
    def _():
        acc_ref[...] = jnp.zeros_like(acc_ref)

    acc_ref[...] += jnp.dot(x_ref[...], w_ref[...],
                            preferred_element_type=jnp.float32)

    @pl.when(pl.program_id(2) == pl.num_programs(2) - 1)
    def _():
        y = acc_ref[...] + b_ref[...].astype(jnp.float32)
        if activation == "gelu":
            # TODO(synk): HF BERT uses exact erf-GELU; tanh approximation kept
            # for guaranteed Mosaic transcendental lowering.
            c = jnp.float32(math.sqrt(2.0 / math.pi))
            y = 0.5 * y * (1.0 + jnp.tanh(c * (y + 0.044715 * y * y * y)))
        o_ref[...] = y.astype(o_ref.dtype)


def dense(x, w, b, activation=None):
    """y = act(x @ w + b).  x:[M,K] bf16, w:[K,N] bf16, b:[N] f32 -> [M,N] bf16."""
    M, K = x.shape
    N = w.shape[1]
    tm = _pick_tile(M, (256, 128))
    tn = _pick_tile(N, (256, 128))
    tk = _pick_tile(K, (512, 256, 128))
    grid = (M // tm, N // tn, K // tk)
    return pl.pallas_call(
        partial(_dense_kernel, activation=activation),
        out_shape=jax.ShapeDtypeStruct((M, N), jnp.bfloat16),
        grid_spec=pltpu.PrefetchScalarGridSpec(
            num_scalar_prefetch=0,
            grid=grid,
            in_specs=[
                pl.BlockSpec((tm, tk), lambda i, j, k: (i, k)),
                pl.BlockSpec((tk, tn), lambda i, j, k: (k, j)),
                pl.BlockSpec((1, tn), lambda i, j, k: (0, j)),
            ],
            out_specs=pl.BlockSpec((tm, tn), lambda i, j, k: (i, j)),
            scratch_shapes=[pltpu.VMEM((tm, tn), jnp.float32)],
        ),
        compiler_params=pltpu.CompilerParams(
            dimension_semantics=("parallel", "parallel", "arbitrary")),
    )(x, w, b.reshape(1, N))


# -------------------------- layernorm (+ residual) --------------------------

def _ln_math(x, g, b):
    mean = jnp.mean(x, axis=-1, keepdims=True)
    xc = x - mean
    var = jnp.mean(xc * xc, axis=-1, keepdims=True)
    return xc * jax.lax.rsqrt(var + jnp.float32(LN_EPS)) * g + b


def _layernorm_kernel(x_ref, g_ref, b_ref, o_ref):
    x = x_ref[...].astype(jnp.float32)
    o_ref[...] = _ln_math(x, g_ref[...].astype(jnp.float32),
                          b_ref[...].astype(jnp.float32)).astype(o_ref.dtype)


def _add_layernorm_kernel(x_ref, r_ref, g_ref, b_ref, o_ref):
    x = x_ref[...].astype(jnp.float32) + r_ref[...].astype(jnp.float32)
    o_ref[...] = _ln_math(x, g_ref[...].astype(jnp.float32),
                          b_ref[...].astype(jnp.float32)).astype(o_ref.dtype)


def layernorm(x, g, b, residual=None):
    """LayerNorm over last dim; optional fused residual add.  Output bf16."""
    M, H = x.shape
    tm = _pick_tile(M, (1024, 512, 256, 128))
    grid = (M // tm,)
    row_spec = pl.BlockSpec((tm, H), lambda i: (i, 0))
    vec_spec = pl.BlockSpec((1, H), lambda i: (0, 0))
    if residual is None:
        kernel = _layernorm_kernel
        in_specs = [row_spec, vec_spec, vec_spec]
        args = (x, g.reshape(1, H), b.reshape(1, H))
    else:
        kernel = _add_layernorm_kernel
        in_specs = [row_spec, row_spec, vec_spec, vec_spec]
        args = (x, residual, g.reshape(1, H), b.reshape(1, H))
    return pl.pallas_call(
        kernel,
        out_shape=jax.ShapeDtypeStruct((M, H), jnp.bfloat16),
        grid_spec=pltpu.PrefetchScalarGridSpec(
            num_scalar_prefetch=0, grid=grid,
            in_specs=in_specs, out_specs=row_spec),
        compiler_params=pltpu.CompilerParams(
            dimension_semantics=("parallel",)),
    )(*args)


# ------------------------------- attention ----------------------------------

def _attn_kernel(qkv_ref, bias_ref, o_ref, *, num_heads, head_dim, hidden, scale):
    # qkv_ref: (1, S, 3H) bf16  (packed [Q | K | V] along the last axis)
    # bias_ref: (1, 1, S) f32 padding-mask bias, broadcast over query rows
    # o_ref:   (1, S, H) bf16
    bias = bias_ref[0].astype(jnp.float32)            # (1, S)
    ctxs = []
    for h in range(num_heads):                         # static unrolled head loop
        lo = h * head_dim
        q = qkv_ref[0, :, lo:lo + head_dim]
        k = qkv_ref[0, :, hidden + lo:hidden + lo + head_dim]
        v = qkv_ref[0, :, 2 * hidden + lo:2 * hidden + lo + head_dim]
        s = jnp.dot(q, k.T, preferred_element_type=jnp.float32)
        s = s * jnp.float32(scale) + bias
        m = jnp.max(s, axis=-1, keepdims=True)
        p = jnp.exp(s - m)
        p = p * pl.reciprocal(jnp.sum(p, axis=-1, keepdims=True), approx=True)
        ctxs.append(jnp.dot(p.astype(jnp.bfloat16), v,
                            preferred_element_type=jnp.float32))
    # Single lane-dense (S, H) store; heads concatenated back at their offsets.
    o_ref[0] = jnp.concatenate(ctxs, axis=-1).astype(o_ref.dtype)


def attention(qkv, bias, num_heads, hidden, scale):
    # TODO(synk): for S beyond ~1-2K convert to a flash-style online-softmax
    # with a KV grid axis instead of materializing the full SxS score matrix.
    B, S, H3 = qkv.shape
    head_dim = hidden // num_heads
    return pl.pallas_call(
        partial(_attn_kernel, num_heads=num_heads, head_dim=head_dim,
                hidden=hidden, scale=scale),
        out_shape=jax.ShapeDtypeStruct((B, S, hidden), jnp.bfloat16),
        grid_spec=pltpu.PrefetchScalarGridSpec(
            num_scalar_prefetch=0, grid=(B,),
            in_specs=[
                pl.BlockSpec((1, S, H3), lambda b: (b, 0, 0)),
                pl.BlockSpec((1, 1, S), lambda b: (b, 0, 0)),
            ],
            out_specs=pl.BlockSpec((1, S, hidden), lambda b: (b, 0, 0)),
        ),
        compiler_params=pltpu.CompilerParams(
            dimension_semantics=("parallel",)),
    )(qkv, bias)


# --------------------------- BERT forward (glue) ---------------------------

def bert_layer(p, x, bias, B, S, num_heads):
    H = x.shape[1]
    d = H // num_heads

    qkv = dense(x, p["qkv_w"], p["qkv_b"])                       # [B*S, 3H] bf16
    ctx = attention(qkv.reshape(B, S, 3 * H), bias, num_heads, H,
                    scale=1.0 / math.sqrt(d))                    # [B, S, H] bf16
    ctx = ctx.reshape(B * S, H)

    attn_out = dense(ctx, p["ao_w"], p["ao_b"])
    x = layernorm(attn_out, p["attn_ln_g"], p["attn_ln_b"], residual=x)

    inter = dense(x, p["i_w"], p["i_b"], activation="gelu")
    ffn_out = dense(inter, p["o_w"], p["o_b"])
    x = layernorm(ffn_out, p["out_ln_g"], p["out_ln_b"], residual=x)
    return x


def model_cls_forward(params, input_ids, attention_mask, token_type_ids):
    """Equivalent of ModelCls.forward: BERT -> last_hidden_state[:, 0]."""
    B, S = input_ids.shape
    H = params["word_emb"].shape[1]

    # Embedding lookups are gathers -> plain JAX glue.
    emb = (params["word_emb"][input_ids]
           + params["pos_emb"][jnp.arange(S)][None, :, :]
           + params["type_emb"][token_type_ids])
    x = layernorm(emb.reshape(B * S, H).astype(jnp.bfloat16),
                  params["emb_ln_g"], params["emb_ln_b"])

    # HF BERT extended attention mask: (1 - mask) * -10000 added to logits.
    bias = ((1.0 - attention_mask.astype(jnp.float32)) * -10000.0).reshape(B, 1, S)

    for layer_params in params["layers"]:
        x = bert_layer(layer_params, x, bias, B, S, params["num_heads"])

    last_hidden_state = x.reshape(B, S, H)
    return last_hidden_state[:, 0].astype(jnp.float32)


# ------------------------------ Param init ---------------------------------

def init_params(key, *, vocab, hidden, num_layers, num_heads, intermediate,
                max_pos, type_vocab):
    def normal(k, shape):
        return (0.02 * jax.random.normal(k, shape)).astype(jnp.float32)

    keys = jax.random.split(key, 3 + num_layers)
    params = {
        "num_heads": num_heads,
        "word_emb": normal(keys[0], (vocab, hidden)),
        "pos_emb": normal(keys[1], (max_pos, hidden)),
        "type_emb": normal(keys[2], (type_vocab, hidden)),
        "emb_ln_g": jnp.ones((hidden,), jnp.float32),
        "emb_ln_b": jnp.zeros((hidden,), jnp.float32),
        "layers": [],
    }
    for li in range(num_layers):
        lk = jax.random.split(keys[3 + li], 6)
        q_w = normal(lk[0], (hidden, hidden))
        k_w = normal(lk[1], (hidden, hidden))
        v_w = normal(lk[2], (hidden, hidden))
        params["layers"].append({
            # Fused QKV projection weight (H, 3H), stored bf16 for the MXU.
            "qkv_w": jnp.concatenate([q_w, k_w, v_w], axis=1).astype(jnp.bfloat16),
            "qkv_b": jnp.zeros((3 * hidden,), jnp.float32),
            "ao_w": normal(lk[3], (hidden, hidden)).astype(jnp.bfloat16),
            "ao_b": jnp.zeros((hidden,), jnp.float32),
            "attn_ln_g": jnp.ones((hidden,), jnp.float32),
            "attn_ln_b": jnp.zeros((hidden,), jnp.float32),
            "i_w": normal(lk[4], (hidden, intermediate)).astype(jnp.bfloat16),
            "i_b": jnp.zeros((intermediate,), jnp.float32),
            "o_w": normal(lk[5], (intermediate, hidden)).astype(jnp.bfloat16),
            "o_b": jnp.zeros((hidden,), jnp.float32),
            "out_ln_g": jnp.ones((hidden,), jnp.float32),
            "out_ln_b": jnp.zeros((hidden,), jnp.float32),
        })
    return params


# --------------------------------- Main -------------------------------------

if __name__ == "__main__":
    B, S = 2, 8
    VOCAB, HIDDEN, LAYERS, HEADS, INTER = 100, 32, 2, 2, 64

    key = jax.random.PRNGKey(0)
    pkey, ikey = jax.random.split(key)

    params = init_params(pkey, vocab=VOCAB, hidden=HIDDEN, num_layers=LAYERS,
                         num_heads=HEADS, intermediate=INTER,
                         max_pos=64, type_vocab=2)

    input_ids = jax.random.randint(ikey, (B, S), 0, VOCAB, dtype=jnp.int32)
    attention_mask = jnp.ones((B, S), dtype=jnp.int32).at[1, S - 2:].set(0)
    token_type_ids = jnp.zeros((B, S), dtype=jnp.int32)

    cls_embedding = model_cls_forward(params, input_ids, attention_mask, token_type_ids)
    cls_embedding = jax.block_until_ready(cls_embedding)
    assert cls_embedding.shape == (B, HIDDEN)
    assert bool(jnp.all(jnp.isfinite(cls_embedding)))
    print("KERNEL_OK")
</pallas_src>

<mosaic_0001>
module attributes {stable_mosaic.version = 11 : i64} {
  func.func @_layernorm_kernel(%arg0: i32, %arg1: memref<16x32xbf16, #tpu.memory_space<vmem>>, %arg2: memref<1x32xf32, #tpu.memory_space<vmem>>, %arg3: memref<1x32xf32, #tpu.memory_space<vmem>>, %arg4: memref<16x32xbf16, #tpu.memory_space<vmem>>) attributes {dimension_semantics = [#tpu.dimension_semantics<parallel>], iteration_bounds = array<i64: 1>, scalar_prefetch = 0 : i64, scratch_operands = 0 : i64, tpu.core_type = #tpu.core_type<tc>, window_params = [{transform_indices = @transform_0, window_bounds = array<i64: 16, 32>}, {pipeline_mode = #tpu.pipeline_mode<synchronous>, transform_indices = @transform_1, window_bounds = array<i64: 1, 32>}, {pipeline_mode = #tpu.pipeline_mode<synchronous>, transform_indices = @transform_2, window_bounds = array<i64: 1, 32>}, {transform_indices = @transform_3, window_bounds = array<i64: 16, 32>}]} {
    %c0 = arith.constant 0 : index
    %c0_0 = arith.constant 0 : index
    %0 = vector.load %arg1[%c0, %c0_0] : memref<16x32xbf16, #tpu.memory_space<vmem>>, vector<16x32xbf16>
    %1 = arith.extf %0 : vector<16x32xbf16> to vector<16x32xf32>
    %c0_1 = arith.constant 0 : index
    %c0_2 = arith.constant 0 : index
    %2 = vector.load %arg2[%c0_1, %c0_2] : memref<1x32xf32, #tpu.memory_space<vmem>>, vector<1x32xf32>
    %c0_3 = arith.constant 0 : index
    %c0_4 = arith.constant 0 : index
    %3 = vector.load %arg3[%c0_3, %c0_4] : memref<1x32xf32, #tpu.memory_space<vmem>>, vector<1x32xf32>
    %cst = arith.constant dense<0.000000e+00> : vector<16xf32>
    %4 = vector.multi_reduction <add>, %1, %cst [1] : vector<16x32xf32> to vector<16xf32>
    %5 = vector.shape_cast %4 : vector<16xf32> to vector<16x1xf32>
    %cst_5 = arith.constant 3.200000e+01 : f32
    %6 = vector.broadcast %cst_5 : f32 to vector<16x1xf32>
    %7 = arith.divf %5, %6 : vector<16x1xf32>
    %8 = vector.broadcast %7 : vector<16x1xf32> to vector<16x32xf32>
    %9 = arith.subf %1, %8 : vector<16x32xf32>
    %10 = arith.mulf %9, %9 : vector<16x32xf32>
    %cst_6 = arith.constant dense<0.000000e+00> : vector<16xf32>
    %11 = vector.multi_reduction <add>, %10, %cst_6 [1] : vector<16x32xf32> to vector<16xf32>
    %12 = vector.shape_cast %11 : vector<16xf32> to vector<16x1xf32>
    %cst_7 = arith.constant 3.200000e+01 : f32
    %13 = vector.broadcast %cst_7 : f32 to vector<16x1xf32>
    %14 = arith.divf %12, %13 : vector<16x1xf32>
    %cst_8 = arith.constant 9.99999996E-13 : f32
    %15 = vector.broadcast %cst_8 : f32 to vector<16x1xf32>
    %16 = arith.addf %14, %15 : vector<16x1xf32>
    %17 = math.rsqrt %16 : vector<16x1xf32>
    %18 = vector.broadcast %17 : vector<16x1xf32> to vector<16x32xf32>
    %19 = arith.mulf %9, %18 : vector<16x32xf32>
    %20 = vector.broadcast %2 : vector<1x32xf32> to vector<16x32xf32>
    %21 = arith.mulf %19, %20 : vector<16x32xf32>
    %22 = vector.broadcast %3 : vector<1x32xf32> to vector<16x32xf32>
    %23 = arith.addf %21, %22 : vector<16x32xf32>
    %24 = arith.truncf %23 : vector<16x32xf32> to vector<16x32xbf16>
    %c0_9 = arith.constant 0 : index
    %c0_10 = arith.constant 0 : index
    %25 = vector.load %arg4[%c0_9, %c0_10] : memref<16x32xbf16, #tpu.memory_space<vmem>>, vector<16x32xbf16>
    tpu.vector_store %arg4[%c0_9, %c0_10], %24 {strides = array<i32>} : memref<16x32xbf16, #tpu.memory_space<vmem>>, vector<16x32xbf16>,
    return
  }
  func.func @transform_0(%arg0: i32) -> (i32, i32) {
    %c0_i32 = arith.constant 0 : i32
    %c0_i32_0 = arith.constant 0 : i32
    return %arg0, %c0_i32 : i32, i32
  }
  func.func @transform_1(%arg0: i32) -> (i32, i32) {
    %c0_i32 = arith.constant 0 : i32
    %c0_i32_0 = arith.constant 0 : i32
    %c0_i32_1 = arith.constant 0 : i32
    return %c0_i32, %c0_i32_0 : i32, i32
  }
  func.func @transform_2(%arg0: i32) -> (i32, i32) {
    %c0_i32 = arith.constant 0 : i32
    %c0_i32_0 = arith.constant 0 : i32
    %c0_i32_1 = arith.constant 0 : i32
    return %c0_i32, %c0_i32_0 : i32, i32
  }
  func.func @transform_3(%arg0: i32) -> (i32, i32) {
    %c0_i32 = arith.constant 0 : i32
    %c0_i32_0 = arith.constant 0 : i32
    return %arg0, %c0_i32 : i32, i32
  }
}

</mosaic_0001>

<bundles_post_ra>
// kernel: tpu_custom_call.1
= control target key start
LH: loop header
LB: loop body
LE: loop exit
PB: predicated region body
PF: predicated region fallthrough
CT: control target
= control target key end

     0   :  { %8 = vsyncpa [#allocation3], 0  ;;  %s237_s0 = inlined_call_operand.hbm [shape: bf16[16,32], index: 0, kind: input, shape index: {}]   ;;  %s238_s1 = inlined_call_operand.vmem [shape: f32[1,32], index: 1, kind: input, shape index: {}]   ;;  %s239_s2 = inlined_call_operand.vmem [shape: f32[1,32], index: 2, kind: input, shape index: {}]   ;;  %s240_s3 = inlined_call_operand.hbm [shape: bf16[16,32], index: 3, kind: output, shape index: {}]  }
   0x1   :  { %9 = vsyncpa [#allocation4], 0  ;;  %s173_s12 = smov [#allocation2]   ;;  %s125_s16 = scalar_lea.hbm %s237_s0, 128 }
   0x2   :  { %s15_s13 = sshll.u32 %s173_s12, 4  ;;  %p126_p0 = scmp.ne.s32.totalorder %s237_s0, %s125_s16  ;;  %s16_s13 = int_to_ptr.vmem [resolvable:$true] %s15_s13 }
   0x3   :  { %p129_p1 = scmp.lt.u32.totalorder %s125_s16, %s237_s0 }
   0x5   :  { %p131_p2 = pnand %p129_p1, %p126_p0 }
   0x7   :  { %134 = shalt.err (!%p131_p2)
}
   0x8   :  { %s135_s21 = scalar_lea.vmem %s16_s13, 128  ;;  %p140_p4 = scmp.lt.s32.totalorder %s16_s13, %s16_s13 }
   0x9   :  { %p136_p3 = scmp.ne.s32.totalorder %s16_s13, %s135_s21  ;;  %p141_p5 = scmp.lt.s32.totalorder %s135_s21, %s135_s21 }
   0xb   :  { %p142_p6 = por %p141_p5, %p140_p4 }
   0xd   :  { %p143_p7 = pnand %p142_p6, %p136_p3 }
   0xf   :  { %146 = shalt.err (!%p143_p7)
}
  0x10   :  { %s174_s22 = smov 64   ;;  %s175_s23 = smov 4  }
  0x11   :  { %21 = dma.hbm_to_vmem [thread:$0]  %s237_s0, 128, %s16_s13, [#allocation3], %s174_s22, %s174_s22, %s175_s23  }
  0x12   :  { %169 = dma.done.wait [#allocation3], 128  }
  0x13   :  { %170 = vsyncadd [#allocation3], 4294967168  ;;  %v114_v0 = vld [vmem:[#allocation2] sm:$0xff]   ;;  %vm35_vm0 = vcmask 261120   ;;  %vm87_vm1 = vcmask 257024   ;;  %s176_s29 = smov [#allocation5]  }
  0x14   :  { %v115_v1 = vunpack.c.l.bf16 %v114_v0  ;;  %v116_v2 = vunpack.c.h.bf16 %v114_v0  ;;  %v107_v22 = vld [vmem:[%s238_s1] ss:$0 sm:$0xff]  ;;  %s95_s30 = sshll.u32 %s176_s29, 4  ;;  %s96_s30 = int_to_ptr.vmem [resolvable:$true] %s95_s30 }
  0x15   :  { %v108_v24 = vld [vmem:[%s239_s2] ss:$0 sm:$0xff]  ;;  %s147_s1 = scalar_lea.vmem %s96_s30, 128  ;;  %p152_p9 = scmp.lt.s32.totalorder %s96_s30, %s96_s30 }
  0x16   :  { %v36_v3 = vsel %vm35_vm0, %v115_v1, 0.0  ;;  %v39_v4 = vsel %vm35_vm0, %v116_v2, 0.0  ;;  %p148_p8 = scmp.ne.s32.totalorder %s96_s30, %s147_s1  ;;  %p153_p10 = scmp.lt.s32.totalorder %s147_s1, %s147_s1 }
  0x17   :  { %37 = vadd.xlane.f32.xlu0 %v36_v3 }
  0x18   :  { %p154_p11 = por %p153_p10, %p152_p9 }
  0x1a   :  { %p155_p12 = pnand %p154_p11, %p148_p8 }
  0x1b   :  { %40 = vadd.xlane.f32.xlu0 %v39_v4 }
  0xa4   :  { %v38_v5 = vpop.xlane.xlu0 %37 }
  0xa5   :  { %v43_v6 = vmul.f32 0.03125, %v38_v5 }
  0xa7   :  { %v45_v7 = vsub.f32 %v115_v1, %v43_v6 }
  0xa8   :  { %v41_v8 = vpop.xlane.xlu0 %40 }
  0xa9   :  { %v44_v9 = vmul.f32 0.03125, %v41_v8  ;;  %v47_v10 = vmul.f32 %v45_v7, %v45_v7 }
  0xab   :  { %v46_v11 = vsub.f32 %v116_v2, %v44_v9  ;;  %v49_v12 = vsel %vm35_vm0, %v47_v10, 0.0 }
  0xac   :  { %50 = vadd.xlane.f32.xlu1 %v49_v12 }
  0xad   :  { %v48_v13 = vmul.f32 %v46_v11, %v46_v11 }
  0xaf   :  { %v52_v14 = vsel %vm35_vm0, %v48_v13, 0.0 }
  0xb0   :  { %53 = vadd.xlane.f32.xlu1 %v52_v14 }
 0x139   :  { %v51_v15 = vpop.xlane.xlu1 %50 }
 0x13a   :  { %v55_v16 = vmul.f32 0.03125, %v51_v15 }
 0x13c   :  { %v57_v17 = vadd.f32 1e-12, %v55_v16 }
 0x13d   :  { %v54_v18 = vpop.xlane.xlu1 %53 }
 0x13e   :  { %121 = vrsqrt.f32 %v57_v17  ;;  %v56_v19 = vmul.f32 0.03125, %v54_v18 }
 0x140   :  { %v58_v20 = vadd.f32 1e-12, %v56_v19 }
 0x142   :  { %123 = vrsqrt.f32 %v58_v20 }
 0x148   :  { %v122_v21 = vpop.eup %121 }
 0x149   :  { %v61_v23 = vmul.f32 %v122_v21, %v45_v7 }
 0x14b   :  { %v69_v25 = vmul.f32 %v107_v22, %v61_v23 }
 0x14c   :  { %v124_v26 = vpop.eup %123 }
 0x14d   :  { %v62_v27 = vmul.f32 %v124_v26, %v46_v11  ;;  %v77_v28 = vadd.f32 %v108_v24, %v69_v25 }
 0x14f   :  { %v70_v29 = vmul.f32 %v107_v22, %v62_v27  ;;  %v111_v30 = vpack.c.bf16 %v77_v28, %v77_v28 }
 0x151   :  { %v78_v31 = vadd.f32 %v108_v24, %v70_v29  ;;  %88 = vst.msk [vmem:[#allocation5] sm:$0xf] %vm87_vm1, %v111_v30 }
 0x153   :  { %v112_v32 = vpack.c.bf16 %v78_v31, %v78_v31 }
 0x155   :  { %89 = vst.msk [vmem:[#allocation5 + $0x4] sm:$0xf] %vm87_vm1, %v112_v32 }
 0x156   :  { %158 = shalt.err (!%p155_p12)
}
 0x157   :  { %s159_s5 = scalar_lea.hbm %s240_s3, 128 }
 0x158   :  { %p160_p13 = scmp.ne.s32.totalorder %s240_s3, %s159_s5  ;;  %p163_p0 = scmp.lt.u32.totalorder %s159_s5, %s240_s3 }
 0x15a   :  { %p165_p1 = pnand %p163_p0, %p160_p13 }
 0x15c   :  { %168 = shalt.err (!%p165_p1)
}
 0x15d   :  { %101 = dma.vmem_to_hbm [thread:$0]  %s96_s30, 128, %s240_s3, [#allocation4], %s174_s22, %s174_s22, %s175_s23  }
 0x15e   :  { %171 = dma.done.wait [#allocation4], 128  }
 0x15f   :  { %172 = vsyncadd [#allocation4], 4294967168 }
 0x160   :  { %105 = vsyncpa [#allocation3], 1 }
 0x161   :  { %106 = vsyncpa [#allocation4], 1 }

</bundles_post_ra>
